<compile_context>
chip_gen: v5e
topology: v5e:2x2
jax: 0.10.0
libtpu: 0.0.40
codegen_flags: <defaults>
</compile_context>

<pallas_src>
import functools

import jax
import jax.numpy as jnp
from jax.experimental import pallas as pl
from jax.experimental.pallas import tpu as pltpu

_BN_EPS = 1e-5  # PyTorch BatchNorm1d default eps


def _resblock_kernel(x_ref, w_ref, b_ref, gamma_ref, beta_ref, mu_ref, var_ref, o_ref):
    # x_ref:     [TB, F_pad]
    # w_ref:     [F_pad, F_pad]   (pre-transposed: y = x @ W)
    # b/gamma/beta/mu/var refs: [1, F_pad]
    # o_ref:     [TB, F_pad]
    x = x_ref[...]
    h = jnp.dot(x, w_ref[...], preferred_element_type=jnp.float32)
    h = jnp.maximum(h + b_ref[...], 0.0)
    # Dropout(p=0.1): identity in eval/inference mode.
    h = h + x  # residual connection
    # BatchNorm1d (eval mode, running stats + affine).
    inv_std = jax.lax.rsqrt(var_ref[...] + _BN_EPS)
    o_ref[...] = ((h - mu_ref[...]) * (inv_std * gamma_ref[...]) + beta_ref[...]).astype(
        o_ref.dtype
    )


@jax.jit
def resblock_forward(x, w_t, b, gamma, beta, running_mean, running_var):
    """Fused ResBlock forward. x: [batch, F], w_t: [F, F] (already transposed)."""
    batch, feat = x.shape
    assert w_t.shape == (feat, feat), "ResBlock residual requires in_features == out_features"

    # Pad feature dim to a lane-dense multiple of 128, batch to a multiple of 8.
    f_pad = pl.cdiv(feat, 128) * 128
    b8 = pl.cdiv(batch, 8) * 8
    tb = b8 if b8 < 128 else 128            # batch tile (sublane-aligned)
    b_pad = pl.cdiv(b8, tb) * tb

    df, db = f_pad - feat, b_pad - batch
    xp = jnp.pad(x, ((0, db), (0, df)))
    wp = jnp.pad(w_t, ((0, df), (0, df)))
    bp = jnp.pad(b, (0, df)).reshape(1, f_pad)
    gp = jnp.pad(gamma, (0, df)).reshape(1, f_pad)
    betap = jnp.pad(beta, (0, df)).reshape(1, f_pad)
    mup = jnp.pad(running_mean, (0, df)).reshape(1, f_pad)
    varp = jnp.pad(running_var, (0, df), constant_values=1.0).reshape(1, f_pad)

    param_spec = pl.BlockSpec((1, f_pad), lambda i: (0, 0))
    out = pl.pallas_call(
        _resblock_kernel,
        out_shape=jax.ShapeDtypeStruct((b_pad, f_pad), jnp.float32),
        grid=(b_pad // tb,),
        in_specs=[
            pl.BlockSpec((tb, f_pad), lambda i: (i, 0)),       # x tile
            pl.BlockSpec((f_pad, f_pad), lambda i: (0, 0)),    # weight (resident)
            param_spec,                                        # bias
            param_spec,                                        # gamma
            param_spec,                                        # beta
            param_spec,                                        # running_mean
            param_spec,                                        # running_var
        ],
        out_specs=pl.BlockSpec((tb, f_pad), lambda i: (i, 0)),
        compiler_params=pltpu.CompilerParams(
            dimension_semantics=("parallel",)
        ),
    )(xp, wp, bp, gp, betap, mup, varp)

    return out[:batch, :feat]


class ResBlockPallas:
    """JAX/Pallas port of ResBlock: BaseBlock(Linear+ReLU+Dropout) + residual + BatchNorm1d."""

    def __init__(self, features: int, key=None):
        if key is None:
            key = jax.random.PRNGKey(0)
        kw, kb = jax.random.split(key)
        # nn.Linear default init: U(-1/sqrt(fan_in), 1/sqrt(fan_in)).
        bound = 1.0 / (features ** 0.5)
        w = jax.random.uniform(kw, (features, features), jnp.float32, -bound, bound)
        self.w_t = jnp.asarray(w.T)                       # [f_in, f_out] for x @ W layout
        self.b = jax.random.uniform(kb, (features,), jnp.float32, -bound, bound)
        # BatchNorm1d default parameters / running stats.
        self.gamma = jnp.ones((features,), jnp.float32)
        self.beta = jnp.zeros((features,), jnp.float32)
        self.running_mean = jnp.zeros((features,), jnp.float32)
        self.running_var = jnp.ones((features,), jnp.float32)

    def __call__(self, x):
        return resblock_forward(
            x, self.w_t, self.b, self.gamma, self.beta, self.running_mean, self.running_var
        )


def _reference_forward(x, w_t, b, gamma, beta, mu, var):
    h = jnp.maximum(x @ w_t + b, 0.0)
    h = h + x
    return (h - mu) / jnp.sqrt(var + _BN_EPS) * gamma + beta


if __name__ == "__main__":
    key = jax.random.PRNGKey(0)
    k_x, k_params = jax.random.split(key)

    batch = 8
    features = 32  # in_features == out_features (required by the residual add)

    x = jax.random.normal(k_x, (batch, features), dtype=jnp.float32)

    model = ResBlockPallas(features, key=k_params)
    out = model(x)
    out = jax.block_until_ready(out)

    assert out.shape == (batch, features), out.shape
    assert out.dtype == jnp.float32

    ref = _reference_forward(
        x, model.w_t, model.b, model.gamma, model.beta, model.running_mean, model.running_var
    )
    assert jnp.allclose(out, ref, rtol=2e-3, atol=2e-3), float(jnp.max(jnp.abs(out - ref)))

    print("KERNEL_OK")
</pallas_src>

<mosaic_0001>
module attributes {stable_mosaic.version = 11 : i64} {
  func.func @_resblock_kernel(%arg0: i32, %arg1: memref<8x128xf32, #tpu.memory_space<vmem>>, %arg2: memref<128x128xf32, #tpu.memory_space<vmem>>, %arg3: memref<1x128xf32, #tpu.memory_space<vmem>>, %arg4: memref<1x128xf32, #tpu.memory_space<vmem>>, %arg5: memref<1x128xf32, #tpu.memory_space<vmem>>, %arg6: memref<1x128xf32, #tpu.memory_space<vmem>>, %arg7: memref<1x128xf32, #tpu.memory_space<vmem>>, %arg8: memref<8x128xf32, #tpu.memory_space<vmem>>) attributes {dimension_semantics = [#tpu.dimension_semantics<parallel>], iteration_bounds = array<i64: 1>, scalar_prefetch = 0 : i64, scratch_operands = 0 : i64, tpu.core_type = #tpu.core_type<tc>, window_params = [{transform_indices = @transform_0, window_bounds = array<i64: 8, 128>}, {pipeline_mode = #tpu.pipeline_mode<synchronous>, transform_indices = @transform_1, window_bounds = array<i64: 128, 128>}, {pipeline_mode = #tpu.pipeline_mode<synchronous>, transform_indices = @transform_2, window_bounds = array<i64: 1, 128>}, {pipeline_mode = #tpu.pipeline_mode<synchronous>, transform_indices = @transform_3, window_bounds = array<i64: 1, 128>}, {pipeline_mode = #tpu.pipeline_mode<synchronous>, transform_indices = @transform_4, window_bounds = array<i64: 1, 128>}, {pipeline_mode = #tpu.pipeline_mode<synchronous>, transform_indices = @transform_5, window_bounds = array<i64: 1, 128>}, {pipeline_mode = #tpu.pipeline_mode<synchronous>, transform_indices = @transform_6, window_bounds = array<i64: 1, 128>}, {transform_indices = @transform_7, window_bounds = array<i64: 8, 128>}]} {
    %c0 = arith.constant 0 : index
    %c0_0 = arith.constant 0 : index
    %0 = vector.load %arg1[%c0, %c0_0] : memref<8x128xf32, #tpu.memory_space<vmem>>, vector<8x128xf32>
    %c0_1 = arith.constant 0 : index
    %c0_2 = arith.constant 0 : index
    %1 = vector.load %arg2[%c0_1, %c0_2] : memref<128x128xf32, #tpu.memory_space<vmem>>, vector<128x128xf32>
    %cst = arith.constant dense<0.000000e+00> : vector<8x128xf32>
    %2 = tpu.matmul %0, %1, %cst {dimension_numbers = #tpu.dot_dimension_numbers<[1], [0], [0], [1], [0, 0, 1, 1], [], []>} : vector<8x128xf32>, vector<128x128xf32>, vector<8x128xf32> -> vector<8x128xf32>
    %c0_3 = arith.constant 0 : index
    %c0_4 = arith.constant 0 : index
    %3 = vector.load %arg3[%c0_3, %c0_4] : memref<1x128xf32, #tpu.memory_space<vmem>>, vector<1x128xf32>
    %4 = vector.broadcast %3 : vector<1x128xf32> to vector<8x128xf32>
    %5 = arith.addf %2, %4 : vector<8x128xf32>
    %cst_5 = arith.constant 0.000000e+00 : f32
    %6 = vector.broadcast %cst_5 : f32 to vector<8x128xf32>
    %7 = arith.maximumf %5, %6 : vector<8x128xf32>
    %8 = arith.addf %7, %0 : vector<8x128xf32>
    %c0_6 = arith.constant 0 : index
    %c0_7 = arith.constant 0 : index
    %9 = vector.load %arg7[%c0_6, %c0_7] : memref<1x128xf32, #tpu.memory_space<vmem>>, vector<1x128xf32>
    %cst_8 = arith.constant 9.99999974E-6 : f32
    %10 = vector.broadcast %cst_8 : f32 to vector<1x128xf32>
    %11 = arith.addf %9, %10 : vector<1x128xf32>
    %12 = math.rsqrt %11 : vector<1x128xf32>
    %c0_9 = arith.constant 0 : index
    %c0_10 = arith.constant 0 : index
    %13 = vector.load %arg6[%c0_9, %c0_10] : memref<1x128xf32, #tpu.memory_space<vmem>>, vector<1x128xf32>
    %14 = vector.broadcast %13 : vector<1x128xf32> to vector<8x128xf32>
    %15 = arith.subf %8, %14 : vector<8x128xf32>
    %c0_11 = arith.constant 0 : index
    %c0_12 = arith.constant 0 : index
    %16 = vector.load %arg4[%c0_11, %c0_12] : memref<1x128xf32, #tpu.memory_space<vmem>>, vector<1x128xf32>
    %17 = arith.mulf %12, %16 : vector<1x128xf32>
    %18 = vector.broadcast %17 : vector<1x128xf32> to vector<8x128xf32>
    %19 = arith.mulf %15, %18 : vector<8x128xf32>
    %c0_13 = arith.constant 0 : index
    %c0_14 = arith.constant 0 : index
    %20 = vector.load %arg5[%c0_13, %c0_14] : memref<1x128xf32, #tpu.memory_space<vmem>>, vector<1x128xf32>
    %21 = vector.broadcast %20 : vector<1x128xf32> to vector<8x128xf32>
    %22 = arith.addf %19, %21 : vector<8x128xf32>
    %c0_15 = arith.constant 0 : index
    %c0_16 = arith.constant 0 : index
    %23 = vector.load %arg8[%c0_15, %c0_16] : memref<8x128xf32, #tpu.memory_space<vmem>>, vector<8x128xf32>
    tpu.vector_store %arg8[%c0_15, %c0_16], %22 {strides = array<i32>} : memref<8x128xf32, #tpu.memory_space<vmem>>, vector<8x128xf32>,
    return
  }
  func.func @transform_0(%arg0: i32) -> (i32, i32) {
    %c0_i32 = arith.constant 0 : i32
    %c0_i32_0 = arith.constant 0 : i32
    return %arg0, %c0_i32 : i32, i32
  }
  func.func @transform_1(%arg0: i32) -> (i32, i32) {
    %c0_i32 = arith.constant 0 : i32
    %c0_i32_0 = arith.constant 0 : i32
    %c0_i32_1 = arith.constant 0 : i32
    return %c0_i32, %c0_i32_0 : i32, i32
  }
  func.func @transform_2(%arg0: i32) -> (i32, i32) {
    %c0_i32 = arith.constant 0 : i32
    %c0_i32_0 = arith.constant 0 : i32
    %c0_i32_1 = arith.constant 0 : i32
    return %c0_i32, %c0_i32_0 : i32, i32
  }
  func.func @transform_3(%arg0: i32) -> (i32, i32) {
    %c0_i32 = arith.constant 0 : i32
    %c0_i32_0 = arith.constant 0 : i32
    %c0_i32_1 = arith.constant 0 : i32
    return %c0_i32, %c0_i32_0 : i32, i32
  }
  func.func @transform_4(%arg0: i32) -> (i32, i32) {
    %c0_i32 = arith.constant 0 : i32
    %c0_i32_0 = arith.constant 0 : i32
    %c0_i32_1 = arith.constant 0 : i32
    return %c0_i32, %c0_i32_0 : i32, i32
  }
  func.func @transform_5(%arg0: i32) -> (i32, i32) {
    %c0_i32 = arith.constant 0 : i32
    %c0_i32_0 = arith.constant 0 : i32
    %c0_i32_1 = arith.constant 0 : i32
    return %c0_i32, %c0_i32_0 : i32, i32
  }
  func.func @transform_6(%arg0: i32) -> (i32, i32) {
    %c0_i32 = arith.constant 0 : i32
    %c0_i32_0 = arith.constant 0 : i32
    %c0_i32_1 = arith.constant 0 : i32
    return %c0_i32, %c0_i32_0 : i32, i32
  }
  func.func @transform_7(%arg0: i32) -> (i32, i32) {
    %c0_i32 = arith.constant 0 : i32
    %c0_i32_0 = arith.constant 0 : i32
    return %arg0, %c0_i32 : i32, i32
  }
}

</mosaic_0001>

<bundles_post_ra>
// kernel: resblock_forward.1
= control target key start
LH: loop header
LB: loop body
LE: loop exit
PB: predicated region body
PF: predicated region fallthrough
CT: control target
= control target key end

     0   :  { %s257_s0 = inlined_call_operand.vmem [shape: f32[8,128], index: 0, kind: input, shape index: {}]   ;;  %s258_s1 = inlined_call_operand.vmem [shape: f32[128,128], index: 1, kind: input, shape index: {}]   ;;  %s259_s2 = inlined_call_operand.vmem [shape: f32[1,128], index: 2, kind: input, shape index: {}]   ;;  %s260_s3 = inlined_call_operand.vmem [shape: f32[1,128], index: 3, kind: input, shape index: {}]   ;;  %s261_s4 = inlined_call_operand.vmem [shape: f32[1,128], index: 4, kind: input, shape index: {}]   ;;  %s262_s5 = inlined_call_operand.vmem [shape: f32[1,128], index: 5, kind: input, shape index: {}]   ;;  %s263_s6 = inlined_call_operand.vmem [shape: f32[1,128], index: 6, kind: input, shape index: {}]   ;;  %s264_s7 = inlined_call_operand.hbm [shape: f32[8,128], index: 7, kind: output, shape index: {}]  }
   0x1   :  { %v43_v0 = vld [vmem:[%s258_s1 + $0x78] sm:$0xff]  ;;  %v42_v1 = vld [vmem:[%s258_s1 + $0x70] sm:$0xff]  ;;  %v41_v2 = vld [vmem:[%s258_s1 + $0x68] sm:$0xff] }
   0x2   :  { %48 = vmatpush.msra.mxu0 %v43_v0  ;;  %v40_v3 = vld [vmem:[%s258_s1 + $0x60] sm:$0xff]  ;;  %v39_v4 = vld [vmem:[%s258_s1 + $0x58] sm:$0xff] }
   0x4   :  { %49 = vmatpush.msra.mxu0 %v42_v1 }
   0x6   :  { %50 = vmatpush.msra.mxu0 %v41_v2 }
   0x7   :  { %12 = vsyncpa [#allocation3], 0  ;;  %v38_v5 = vld [vmem:[%s258_s1 + $0x50] sm:$0xff]  ;;  %v37_v6 = vld [vmem:[%s258_s1 + $0x48] sm:$0xff] }
   0x8   :  { %51 = vmatpush.msra.mxu0 %v40_v3  ;;  %v36_v7 = vld [vmem:[%s258_s1 + $0x40] sm:$0xff]  ;;  %v35_v8 = vld [vmem:[%s258_s1 + $0x38] sm:$0xff]  ;;  %v34_v9 = vld [vmem:[%s258_s1 + $0x30] sm:$0xff] }
   0x9   :  { %v33_v10 = vld [vmem:[%s258_s1 + $0x28] sm:$0xff]  ;;  %v32_v11 = vld [vmem:[%s258_s1 + $0x20] sm:$0xff]  ;;  %v31_v12 = vld [vmem:[%s258_s1 + $0x18] sm:$0xff] }
   0xa   :  { %52 = vmatpush.msra.mxu0 %v39_v4  ;;  %v30_v13 = vld [vmem:[%s258_s1 + $0x10] sm:$0xff]  ;;  %v29_v14 = vld [vmem:[%s258_s1 + $0x8] sm:$0xff]  ;;  %v28_v15 = vld [vmem:[%s258_s1] sm:$0xff] }
   0xb   :  { %v27_v16 = vld [vmem:[%s257_s0] sm:$0xff] }
   0xc   :  { %53 = vmatpush.msra.mxu0 %v38_v5  ;;  %v70_v17 = vld [vmem:[%s263_s6] sm:$0x1] }
   0xd   :  { %v71_v18 = vadd.f32 1e-05, %v70_v17  ;;  %v116_v25 = vld [vmem:[%s259_s2] ss:$0 sm:$0xff]  ;;  %s147_s2 = smov [#allocation2]  }
   0xe   :  { %54 = vmatpush.msra.mxu0 %v37_v6  ;;  %v87_v27 = vld [vmem:[%s260_s3] sm:$0x1]  ;;  %s104_s19 = sshll.u32 %s147_s2, 4  ;;  %s106_s3 = sshll.u32 %s264_s7, 4  ;;  %s105_s19 = int_to_ptr.vmem [resolvable:$true] %s104_s19  ;;  %s107_s3 = int_to_ptr.hbm [resolvable:$true] %s106_s3 }
   0xf   :  { %119 = vrsqrt.f32 %v71_v18  ;;  %vm78_vm0 = vweird.f32 %v71_v18  ;;  %v117_v32 = vld [vmem:[%s262_s5] ss:$0 sm:$0xff] }
  0x10   :  { %55 = vmatpush.msra.mxu0 %v36_v7  ;;  %v118_v36 = vld [vmem:[%s261_s4] ss:$0 sm:$0xff] }
  0x12   :  { %56 = vmatpush.msra.mxu0 %v35_v8 }
  0x14   :  { %57 = vmatpush.msra.mxu0 %v34_v9 }
  0x15   :  { %v120_v19 = vpop.eup %119 }
  0x16   :  { %58 = vmatpush.msra.mxu0 %v33_v10  ;;  %v73_v20 = vmul.f32 %v120_v19, %v71_v18  ;;  %vm79_vm1 = vweird.f32 %v120_v19 }
  0x17   :  { %vm80_vm2 = vmor %vm78_vm0, %vm79_vm1 }
  0x18   :  { %59 = vmatpush.msra.mxu0 %v32_v11  ;;  %v74_v21 = vmul.f32 %v120_v19, %v73_v20 }
  0x1a   :  { %60 = vmatpush.msra.mxu0 %v31_v12  ;;  %v75_v22 = vmul.f32 0.5, %v74_v21 }
  0x1c   :  { %61 = vmatpush.msra.mxu0 %v30_v13  ;;  %v76_v23 = vsub.f32 1.5, %v75_v22 }
  0x1e   :  { %62 = vmatpush.msra.mxu0 %v29_v14  ;;  %v77_v24 = vmul.f32 %v120_v19, %v76_v23 }
  0x20   :  { %63 = vmatpush.msra.mxu0 %v28_v15  ;;  %v81_v26 = vsel %vm80_vm2, %v120_v19, %v77_v24 }
  0x21   :  { %64 = vmatmul.f32.vlgmr.msra.gmra.mxu0 %v27_v16  ;;  %v88_v30 = vmul.f32 %v87_v27, %v81_v26 }
  0x23   :  { %v90_v34 = vperm.slane %v88_v30, 0 }
  0x9e   :  { %v65_v28 = vpop.f32.mrf.mxu0 }
  0x9f   :  { %v66_v29 = vadd.f32 %v116_v25, %v65_v28 }
  0xa1   :  { %v68_v31 = vmax.f32 %v66_v29, 0.0 }
  0xa3   :  { %v69_v33 = vadd.f32 %v68_v31, %v27_v16 }
  0xa5   :  { %v86_v35 = vsub.f32 %v69_v33, %v117_v32 }
  0xa7   :  { %v92_v37 = vmul.f32 %v90_v34, %v86_v35 }
  0xa9   :  { %v97_v38 = vadd.f32 %v118_v36, %v92_v37 }
  0xab   :  { %98 = vst [vmem:[#allocation2] sm:$0xff] %v97_v38 }
  0xac   :  { %109 = dma.vmem_to_hbm [thread:$0]  %s105_s19, 128, %s107_s3, [#allocation3]  }
  0xad   :  { %145 = dma.done.wait [#allocation3], 128  }
  0xae   :  { %146 = vsyncadd [#allocation3], 4294967168 }
  0xaf   :  { %114 = vsyncpa [#allocation3], 1 }

</bundles_post_ra>
